<compile_context>
chip_gen: v5e
topology: v5e:2x2
jax: 0.10.0
libtpu: 0.0.40
codegen_flags: <defaults>
</compile_context>

<pallas_src>
import functools

import jax
import jax.numpy as jnp
from jax.experimental import pallas as pl
from jax.experimental.pallas import tpu as pltpu

EPS = 1e-6


def _int_pow(x, n):
    """x ** n for static integer n >= 1 via square-and-multiply (VPU only)."""
    result = None
    base = x
    while n > 0:
        if n & 1:
            result = base if result is None else result * base
        n >>= 1
        if n:
            base = base * base
    return result


def _gem_kernel_static(x_ref, o_ref, *, p_int, eps):
    """Static integer-p fast path: x**p via VPU multiplies (no per-elem EUP)."""
    x = jnp.maximum(x_ref[...].astype(jnp.float32), eps)     # clamp(min=eps)
    xp = _int_pow(x, p_int)                                   # x ** p on VPU
    pooled = jnp.mean(xp, axis=-1, keepdims=True)             # avg over H*W
    # pow(1/p) only on the (TM, 1) pooled vector -> negligible EUP traffic.
    o_ref[...] = jnp.exp(jnp.log(pooled) * (1.0 / p_int)).astype(o_ref.dtype)


def _gem_kernel_dynamic(p_ref, x_ref, o_ref, *, eps):
    """Runtime-p path: p_ref is an SMEM scalar, x_ref a (TM, HW) VMEM tile."""
    p = p_ref[0]
    x = jnp.maximum(x_ref[...].astype(jnp.float32), eps)      # clamp(min=eps)
    xp = jnp.exp(p * jnp.log(x))                               # x ** p (x > 0)
    pooled = jnp.mean(xp, axis=-1, keepdims=True)              # avg over H*W
    o_ref[...] = jnp.exp(jnp.log(pooled) / p).astype(o_ref.dtype)


def _choose_tm(nc, hw, itemsize):
    """Largest sublane-aligned row-tile whose f32 working set is ~2 MiB."""
    # Sublane multiple for the *native* dtype layout of the input block.
    sub = 8 if itemsize >= 4 else (16 if itemsize == 2 else 32)
    # Size the tile by its f32 footprint (in-kernel upcast), not input bytes.
    target_rows = (2 * 1024 * 1024) // max(1, hw * 4)
    tm = max(sub, (target_rows // sub) * sub)
    nc_padded = ((nc + sub - 1) // sub) * sub
    return min(tm, nc_padded)


def gem_pallas(x, p, eps=EPS):
    """x: (N, C, H, W); p: scalar / (1,) array. Returns (N, C, 1, 1)."""
    eps = float(eps)
    N, C, H, W = x.shape
    nc, hw = N * C, H * W
    x2d = x.reshape(nc, hw)                 # native dtype; cast to f32 in-kernel

    itemsize = jnp.dtype(x.dtype).itemsize
    tm = _choose_tm(nc, hw, itemsize)
    grid = (pl.cdiv(nc, tm),)

    # Static integer-p fast path only when p is a concrete (non-traced) value.
    p_static = None
    if not isinstance(p, jax.core.Tracer):
        p_val = float(jnp.asarray(p).reshape(()))
        if abs(p_val - round(p_val)) < 1e-12 and 1 <= int(round(p_val)) <= 8:
            p_static = int(round(p_val))

    x_spec = pl.BlockSpec((tm, hw), lambda i: (i, 0))
    o_spec = pl.BlockSpec((tm, 1), lambda i: (i, 0))
    compiler_params = pltpu.CompilerParams(
        dimension_semantics=("parallel",),
        vmem_limit_bytes=32 * 1024 * 1024,
    )
    if p_static is not None:
        flops = nc * hw * (p_static + 2)
        transcendentals = 2 * nc
    else:
        flops = 3 * nc * hw
        transcendentals = 2 * nc * hw + 2 * nc
    cost = pl.CostEstimate(
        flops=flops,
        transcendentals=transcendentals,
        bytes_accessed=nc * hw * itemsize + nc * itemsize,
    )
    out_shape = jax.ShapeDtypeStruct((nc, 1), x.dtype)

    if p_static is not None:
        out2d = pl.pallas_call(
            functools.partial(_gem_kernel_static, p_int=p_static, eps=eps),
            out_shape=out_shape,
            grid=grid,
            in_specs=[x_spec],
            out_specs=o_spec,
            compiler_params=compiler_params,
            cost_estimate=cost,
        )(x2d)
    else:
        p_arr = jnp.asarray(p, dtype=jnp.float32).reshape(1)
        out2d = pl.pallas_call(
            functools.partial(_gem_kernel_dynamic, eps=eps),
            out_shape=out_shape,
            grid=grid,
            in_specs=[
                pl.BlockSpec(memory_space=pltpu.SMEM),   # p (scalar)
                x_spec,                                  # x2d tiles
            ],
            out_specs=o_spec,
            compiler_params=compiler_params,
            cost_estimate=cost,
        )(p_arr, x2d)

    return out2d.reshape(N, C, 1, 1)


def gem_reference(x, p, eps=EPS):
    """Pure-JAX reference matching the PyTorch forward."""
    p = jnp.asarray(p, dtype=jnp.float32).reshape(())
    xc = jnp.maximum(x.astype(jnp.float32), eps)
    pooled = jnp.mean(xc ** p, axis=(-2, -1), keepdims=True)
    return (pooled ** (1.0 / p)).astype(x.dtype)


if __name__ == "__main__":
    key = jax.random.PRNGKey(0)
    N, C, H, W = 2, 4, 16, 16
    x = jax.random.normal(key, (N, C, H, W), dtype=jnp.float32)

    # Deterministic parameter init: p = ones(1) * 3  (as in GeM.__init__)
    # -> exercises the static integer-p fast path.
    p3 = jnp.ones((1,), dtype=jnp.float32) * 3.0
    y = gem_pallas(x, p3)
    jax.block_until_ready(y)
    y_ref = gem_reference(x, p3)
    assert y.shape == (N, C, 1, 1), y.shape
    assert jnp.allclose(y, y_ref, rtol=1e-4, atol=1e-5), (
        float(jnp.max(jnp.abs(y - y_ref)))
    )

    # Non-integer p exercises the dynamic (runtime-p) kernel path.
    p_frac = jnp.ones((1,), dtype=jnp.float32) * 2.5
    y2 = gem_pallas(x, p_frac)
    jax.block_until_ready(y2)
    y2_ref = gem_reference(x, p_frac)
    assert jnp.allclose(y2, y2_ref, rtol=1e-4, atol=1e-5), (
        float(jnp.max(jnp.abs(y2 - y2_ref)))
    )

    print("KERNEL_OK")
</pallas_src>

<mosaic_0001>
module attributes {stable_mosaic.version = 11 : i64} {
  func.func @_gem_kernel_static(%arg0: i32, %arg1: memref<8x256xf32, #tpu.memory_space<vmem>>, %arg2: memref<8x1xf32, #tpu.memory_space<vmem>>) attributes {dimension_semantics = [#tpu.dimension_semantics<parallel>], iteration_bounds = array<i64: 1>, scalar_prefetch = 0 : i64, scratch_operands = 0 : i64, tpu.core_type = #tpu.core_type<tc>, window_params = [{transform_indices = @transform_0, window_bounds = array<i64: 8, 256>}, {transform_indices = @transform_1, window_bounds = array<i64: 8, 1>}]} {
    %c0 = arith.constant 0 : index
    %c0_0 = arith.constant 0 : index
    %0 = vector.load %arg1[%c0, %c0_0] : memref<8x256xf32, #tpu.memory_space<vmem>>, vector<8x256xf32>
    %cst = arith.constant 9.99999997E-7 : f32
    %1 = vector.broadcast %cst : f32 to vector<8x256xf32>
    %2 = arith.maximumf %0, %1 : vector<8x256xf32>
    %3 = arith.mulf %2, %2 : vector<8x256xf32>
    %4 = arith.mulf %2, %3 : vector<8x256xf32>
    %cst_1 = arith.constant dense<0.000000e+00> : vector<8xf32>
    %5 = vector.multi_reduction <add>, %4, %cst_1 [1] : vector<8x256xf32> to vector<8xf32>
    %6 = vector.shape_cast %5 : vector<8xf32> to vector<8x1xf32>
    %cst_2 = arith.constant 2.560000e+02 : f32
    %7 = vector.broadcast %cst_2 : f32 to vector<8x1xf32>
    %8 = arith.divf %6, %7 : vector<8x1xf32>
    %9 = math.log %8 : vector<8x1xf32>
    %cst_3 = arith.constant 0.333333343 : f32
    %10 = vector.broadcast %cst_3 : f32 to vector<8x1xf32>
    %11 = arith.mulf %9, %10 : vector<8x1xf32>
    %12 = math.exp %11 : vector<8x1xf32>
    %c0_4 = arith.constant 0 : index
    %c0_5 = arith.constant 0 : index
    %13 = vector.load %arg2[%c0_4, %c0_5] : memref<8x1xf32, #tpu.memory_space<vmem>>, vector<8x1xf32>
    tpu.vector_store %arg2[%c0_4, %c0_5], %12 {strides = array<i32>} : memref<8x1xf32, #tpu.memory_space<vmem>>, vector<8x1xf32>,
    return
  }
  func.func @transform_0(%arg0: i32) -> (i32, i32) {
    %c0_i32 = arith.constant 0 : i32
    %c0_i32_0 = arith.constant 0 : i32
    return %arg0, %c0_i32 : i32, i32
  }
  func.func @transform_1(%arg0: i32) -> (i32, i32) {
    %c0_i32 = arith.constant 0 : i32
    %c0_i32_0 = arith.constant 0 : i32
    return %arg0, %c0_i32 : i32, i32
  }
}

</mosaic_0001>

<bundles_post_ra>
// kernel: tpu_custom_call.1
= control target key start
LH: loop header
LB: loop body
LE: loop exit
PB: predicated region body
PF: predicated region fallthrough
CT: control target
= control target key end

     0   :  { %6 = vsyncpa [#allocation3], 0  ;;  %s87_s9 = smov [#allocation2]   ;;  %s105_s0 = inlined_call_operand.hbm [shape: f32[8,256], index: 0, kind: input, shape index: {}]   ;;  %s106_s1 = inlined_call_operand.vmem [shape: f32[8,1], index: 1, kind: output, shape index: {}]  }
   0x1   :  { %s12_s8 = sshll.u32 %s105_s0, 4  ;;  %s14_s10 = sshll.u32 %s87_s9, 4  ;;  %s13_s8 = int_to_ptr.hbm [resolvable:$true] %s12_s8  ;;  %s15_s10 = int_to_ptr.vmem [resolvable:$true] %s14_s10 }
   0x2   :  { %17 = dma.hbm_to_vmem [thread:$0]  %s13_s8, 256, %s15_s10, [#allocation3]  }
   0x3   :  { %85 = dma.done.wait [#allocation3], 256  }
   0x4   :  { %86 = vsyncadd [#allocation3], 4294967040  ;;  %v22_v0 = vld [vmem:[#allocation2] sm:$0xff]  ;;  %v23_v1 = vld [vmem:[#allocation2 + $0x8] sm:$0xff]  ;;  %v88_v9 = vmov 256.0   ;;  %vm46_vm1 = vcmask 7168  }
   0x5   :  { %v24_v2 = vmax.f32 %v22_v0, 1e-06  ;;  %v25_v3 = vmax.f32 %v23_v1, 1e-06  ;;  %55 = vrcp.f32 %v88_v9 }
   0x7   :  { %v26_v4 = vmul.f32 %v24_v2, %v24_v2  ;;  %v27_v5 = vmul.f32 %v25_v3, %v25_v3 }
   0x9   :  { %v28_v6 = vmul.f32 %v26_v4, %v24_v2  ;;  %v29_v7 = vmul.f32 %v27_v5, %v25_v3 }
   0xb   :  { %v30_v8 = vadd.f32 %v29_v7, %v28_v6  ;;  %v56_v10 = vpop.eup %55 }
   0xc   :  { %v34_v11 = vmul.f32 256.0, %v56_v10  ;;  %vm38_vm0 = vweird.f32 %v56_v10 }
   0xd   :  { %31 = vadd.xlane.f32.xlu0 %v30_v8 }
   0xe   :  { %v35_v12 = vsub.f32 1.0, %v34_v11 }
  0x10   :  { %v36_v13 = vmul.f32 %v56_v10, %v35_v12 }
  0x12   :  { %v37_v14 = vadd.f32 %v56_v10, %v36_v13 }
  0x14   :  { %v39_v15 = vsel %vm38_vm0, %v56_v10, %v37_v14 }
  0x80   :  { %v32_v16 = vpop.xlane.xlu0 %31 }
  0x81   :  { %v40_v17 = vmul.f32 %v39_v15, %v32_v16 }
  0x83   :  { %57 = vlog2.f32 %v40_v17 }
  0x89   :  { %v58_v18 = vpop.eup %57 }
  0x8a   :  { %v42_v19 = vmul.f32 0.6931472, %v58_v18 }
  0x8c   :  { %v43_v20 = vmul.f32 0.33333334, %v42_v19 }
  0x8e   :  { %v44_v21 = vmul.f32 1.442695, %v43_v20 }
  0x90   :  { %59 = vpow2.f32 %v44_v21 }
  0x96   :  { %v60_v22 = vpop.eup %59 }
  0x97   :  { %47 = vst.msk [vmem:[%s106_s1] sm:$0xff] %vm46_vm1, %v60_v22 }
  0x98   :  { %52 = vsyncpa [#allocation3], 1 }

</bundles_post_ra>
